<compile_context>
chip_gen: v7x
topology: tpu7x:2x2x1
jax: 0.10.0
libtpu: 0.0.40
codegen_flags: <defaults>
</compile_context>

<pallas_src>
import functools

import jax
import jax.numpy as jnp
from jax import lax
from jax.experimental import pallas as pl
from jax.experimental.pallas import tpu as pltpu

EPS = 1e-5  # BatchNorm2d default eps

_VMEM_TILE_BUDGET = 44 << 20   # keep pipeline buffers well inside v7x's 64 MiB physical VMEM
_VMEM_LIMIT_CAP = 56 << 20


def _round_up(x, m):
    return ((x + m - 1) // m) * m


def _downsample_avg_kernel(apply_act, inv_taps,
                           x_ref,      # (T, C_in, TM)       pooling taps x channels x lane-dense spatial (bf16)
                           w_ref,      # (C_out_t, C_in)     1x1 conv weight tile (bf16)
                           scale_ref,  # (C_out_t, 1)        gamma / sqrt(var + eps)
                           shift_ref,  # (C_out_t, 1)        beta - mean * scale
                           o_ref):     # (C_out_t, TM)
    x = x_ref[...].astype(jnp.float32)                    # elementwise math stays f32 (v5e-safe)
    xp = jnp.sum(x, axis=0) * inv_taps                    # (C_in, TM)  2x2 average pool on VPU
    z = jnp.dot(w_ref[...], xp.astype(jnp.bfloat16),      # bf16 operands, f32 accumulation (MXU)
                preferred_element_type=jnp.float32)       # (C_out_t, TM)
    y = z * scale_ref[...] + shift_ref[...]               # fused eval-mode BatchNorm affine
    if apply_act:                                         # LayerFn.act = ReLU when apply_act=True
        y = jnp.maximum(y, 0.0)
    o_ref[...] = y.astype(o_ref.dtype)


def _pipeline_vmem_bytes(taps, cin, cout_tile, lane_tile, x_itemsize, out_itemsize):
    """Approximate double-buffered VMEM footprint of one pipeline stage."""
    x_blk = taps * cin * lane_tile * x_itemsize
    o_blk = cout_tile * lane_tile * out_itemsize
    w_blk = cout_tile * cin * 2          # bf16 weight tile
    bn_blk = 2 * cout_tile * 4           # f32 scale + shift
    return 2 * (x_blk + o_blk + w_blk + bn_blk)


def _pick_lane_tile(M, max_tile=1024):
    """Largest power-of-two lane tile (>=256 preferred for MXU N) with <=12.5% padding;
    halved if needed so the lane grid keeps >=2 steps (v7x megacore) when M allows."""
    tile = 128
    for cand in (1024, 512, 256):
        if cand > max_tile:
            continue
        mp = _round_up(M, cand)
        if (mp - M) * 8 <= mp:
            tile = cand
            break
    while tile > 128 and -(-M // tile) < 2:
        tile //= 2
    return tile


def _pick_cout_tile(cout, max_tile=512):
    """Tile very wide C_out (e.g. 2048) so the f32 output block stays small on v7x."""
    if cout <= max_tile:
        return cout
    for t in range(max_tile, 7, -8):
        if cout % t == 0:
            return t
    return cout


def downsample_avg(x, w, gamma, beta, mean, var, *, stride=1, dilation=1,
                   apply_act=False, max_lane_tile=1024, max_cout_tile=512):
    """Pallas forward of DownsampleAvg: AvgPool2d(2, stride) -> Conv1x1 -> BatchNorm [-> ReLU]."""
    B, Cin, H, W = x.shape
    Cout = w.shape[0]
    avg_stride = stride if dilation == 1 else 1

    # bf16 input DMA (op is HBM-bound); the cast fuses into the same layout pass below.
    xc = x.astype(jnp.bfloat16)

    if stride > 1 or dilation > 1:
        # TODO(synk): only the common avg_stride==2 / even-H,W path is implemented; ceil_mode
        # edge handling (count_include_pad=False on odd dims) and AvgPool2dSame (dilation>1)
        # are not translated.
        assert avg_stride == 2 and H % 2 == 0 and W % 2 == 0
        Ho, Wo = H // 2, W // 2
        taps = 4
        xt = xc.reshape(B, Cin, Ho, 2, Wo, 2)
        xt = xt.transpose(3, 5, 1, 0, 2, 4).reshape(taps, Cin, B * Ho * Wo)
    else:
        Ho, Wo = H, W
        taps = 1
        xt = xc.transpose(1, 0, 2, 3).reshape(taps, Cin, B * H * W)

    M = B * Ho * Wo
    out_dtype = x.dtype
    out_itemsize = jnp.dtype(out_dtype).itemsize

    cout_tile = _pick_cout_tile(Cout, max_cout_tile)
    lane_tile = _pick_lane_tile(M, max_lane_tile)
    # Clamp lane tile so the double-buffered pipeline fits the cross-generation VMEM budget.
    while lane_tile > 128 and _pipeline_vmem_bytes(
            taps, Cin, cout_tile, lane_tile, 2, out_itemsize) > _VMEM_TILE_BUDGET:
        lane_tile //= 2

    Mp = _round_up(M, lane_tile)
    if Mp != M:
        xt = jnp.pad(xt, ((0, 0), (0, 0), (0, Mp - M)))

    # Fold BatchNorm (eval mode) into a per-output-channel scale/shift.
    scale = (gamma / jnp.sqrt(var + EPS)).astype(jnp.float32)[:, None]
    shift = (beta.astype(jnp.float32) - mean.astype(jnp.float32) * scale[:, 0])[:, None]
    w_bf16 = w.astype(jnp.bfloat16)

    n_lane = Mp // lane_tile
    n_cout = Cout // cout_tile
    need = _pipeline_vmem_bytes(taps, Cin, cout_tile, lane_tile, 2, out_itemsize)
    vmem_limit = int(min(max(need * 1.25 + (4 << 20), 32 << 20), _VMEM_LIMIT_CAP))

    # Grid: lane blocks OUTER, C_out blocks INNER -> x's block index is constant across the
    # inner axis, so Pallas skips re-fetching the (taps, Cin, TM) slab per C_out tile.
    grid = (n_lane, n_cout)
    out = pl.pallas_call(
        functools.partial(_downsample_avg_kernel, bool(apply_act), 1.0 / taps),
        out_shape=jax.ShapeDtypeStruct((Cout, Mp), out_dtype),
        grid=grid,
        in_specs=[
            pl.BlockSpec((taps, Cin, lane_tile), lambda i, c: (0, 0, i)),
            pl.BlockSpec((cout_tile, Cin), lambda i, c: (c, 0)),
            pl.BlockSpec((cout_tile, 1), lambda i, c: (c, 0)),
            pl.BlockSpec((cout_tile, 1), lambda i, c: (c, 0)),
        ],
        out_specs=pl.BlockSpec((cout_tile, lane_tile), lambda i, c: (c, i)),
        compiler_params=pltpu.CompilerParams(
            dimension_semantics=("parallel", "parallel"),
            vmem_limit_bytes=vmem_limit),
    )(xt, w_bf16, scale, shift)

    # TODO(synk): the xt transpose/pad above and this slice/reshape/transpose are full-tensor
    # HBM passes outside the kernel; when integrating into a model, fuse them into neighbouring
    # ops (or try CompilerParams(allow_input_fusion=...)) and profile the whole jit in xprof.
    out = out[:, :M].reshape(Cout, B, Ho, Wo).transpose(1, 0, 2, 3)   # back to (B, C_out, Ho, Wo)
    return out


def ref_forward(x, w, gamma, beta, mean, var, *, stride=1, dilation=1, apply_act=False):
    """Pure-JAX reference matching the PyTorch module (eval mode)."""
    avg_stride = stride if dilation == 1 else 1
    if stride > 1 or dilation > 1:
        B, C, H, W = x.shape
        xp = x.reshape(B, C, H // avg_stride, avg_stride,
                       W // avg_stride, avg_stride).mean(axis=(3, 5))
    else:
        xp = x
    z = jnp.einsum('oc,bchw->bohw', w, xp, precision=lax.Precision.HIGHEST)
    y = (z - mean[None, :, None, None]) / jnp.sqrt(var + EPS)[None, :, None, None]
    y = y * gamma[None, :, None, None] + beta[None, :, None, None]
    if apply_act:
        y = jnp.maximum(y, 0.0)
    return y


if __name__ == "__main__":
    key = jax.random.PRNGKey(0)
    kx, kw, kg, kb, km, kv = jax.random.split(key, 6)

    B, Cin, H, W = 2, 4, 16, 16
    Cout = 8

    x = jax.random.normal(kx, (B, Cin, H, W), jnp.float32)
    w = 0.2 * jax.random.normal(kw, (Cout, Cin), jnp.float32)         # 1x1 conv, bias=False
    gamma = 1.0 + 0.1 * jax.random.normal(kg, (Cout,), jnp.float32)   # BN weight
    beta = 0.1 * jax.random.normal(kb, (Cout,), jnp.float32)          # BN bias
    mean = 0.1 * jax.random.normal(km, (Cout,), jnp.float32)          # BN running_mean
    var = 0.5 + jax.random.uniform(kv, (Cout,), jnp.float32)          # BN running_var

    configs = [dict(stride=2, apply_act=False),   # classic 'D'-variant downsample path
               dict(stride=1, apply_act=False)]   # identity-pool path (module default)
    for cfg in configs:
        out = downsample_avg(x, w, gamma, beta, mean, var, **cfg)
        out = jax.block_until_ready(out)
        ref = ref_forward(x, w, gamma, beta, mean, var, **cfg)
        assert out.shape == ref.shape, (out.shape, ref.shape)
        err = float(jnp.max(jnp.abs(out - ref)))
        if err > 5e-2:   # bf16 input/matmul operands vs f32-HIGHEST reference
            raise AssertionError(f"kernel mismatch vs reference for {cfg}: max abs err = {err}")

    print("KERNEL_OK")
</pallas_src>

<mosaic_0001>
module attributes {stable_mosaic.version = 11 : i64} {
  func.func @_downsample_avg_kernel(%arg0: i32, %arg1: i32, %arg2: memref<4x4x128xbf16, #tpu.memory_space<vmem>>, %arg3: memref<8x4xbf16, #tpu.memory_space<vmem>>, %arg4: memref<8x1xf32, #tpu.memory_space<vmem>>, %arg5: memref<8x1xf32, #tpu.memory_space<vmem>>, %arg6: memref<8x128xf32, #tpu.memory_space<vmem>>) attributes {dimension_semantics = [#tpu.dimension_semantics<parallel>, #tpu.dimension_semantics<parallel>], iteration_bounds = array<i64: 1, 1>, scalar_prefetch = 0 : i64, scratch_operands = 0 : i64, tpu.core_type = #tpu.core_type<tc>, window_params = [{transform_indices = @transform_0, window_bounds = array<i64: 4, 4, 128>}, {transform_indices = @transform_1, window_bounds = array<i64: 8, 4>}, {transform_indices = @transform_2, window_bounds = array<i64: 8, 1>}, {transform_indices = @transform_3, window_bounds = array<i64: 8, 1>}, {transform_indices = @transform_4, window_bounds = array<i64: 8, 128>}]} {
    %c0 = arith.constant 0 : index
    %c0_0 = arith.constant 0 : index
    %c0_1 = arith.constant 0 : index
    %0 = vector.load %arg2[%c0, %c0_0, %c0_1] : memref<4x4x128xbf16, #tpu.memory_space<vmem>>, vector<4x4x128xbf16>
    %1 = arith.extf %0 : vector<4x4x128xbf16> to vector<4x4x128xf32>
    %cst = arith.constant dense<0.000000e+00> : vector<4x128xf32>
    %2 = vector.multi_reduction <add>, %1, %cst [0] : vector<4x4x128xf32> to vector<4x128xf32>
    %cst_2 = arith.constant 2.500000e-01 : f32
    %3 = vector.broadcast %cst_2 : f32 to vector<4x128xf32>
    %4 = arith.mulf %2, %3 : vector<4x128xf32>
    %c0_3 = arith.constant 0 : index
    %c0_4 = arith.constant 0 : index
    %5 = vector.load %arg3[%c0_3, %c0_4] : memref<8x4xbf16, #tpu.memory_space<vmem>>, vector<8x4xbf16>
    %6 = arith.truncf %4 : vector<4x128xf32> to vector<4x128xbf16>
    %cst_5 = arith.constant dense<0.000000e+00> : vector<8x128xf32>
    %7 = tpu.matmul %5, %6, %cst_5 {dimension_numbers = #tpu.dot_dimension_numbers<[1], [0], [0], [1], [0, 0, 1, 1], [], []>} : vector<8x4xbf16>, vector<4x128xbf16>, vector<8x128xf32> -> vector<8x128xf32>
    %c0_6 = arith.constant 0 : index
    %c0_7 = arith.constant 0 : index
    %8 = vector.load %arg4[%c0_6, %c0_7] : memref<8x1xf32, #tpu.memory_space<vmem>>, vector<8x1xf32>
    %9 = vector.broadcast %8 : vector<8x1xf32> to vector<8x128xf32>
    %10 = arith.mulf %7, %9 : vector<8x128xf32>
    %c0_8 = arith.constant 0 : index
    %c0_9 = arith.constant 0 : index
    %11 = vector.load %arg5[%c0_8, %c0_9] : memref<8x1xf32, #tpu.memory_space<vmem>>, vector<8x1xf32>
    %12 = vector.broadcast %11 : vector<8x1xf32> to vector<8x128xf32>
    %13 = arith.addf %10, %12 : vector<8x128xf32>
    %c0_10 = arith.constant 0 : index
    %c0_11 = arith.constant 0 : index
    %14 = vector.load %arg6[%c0_10, %c0_11] : memref<8x128xf32, #tpu.memory_space<vmem>>, vector<8x128xf32>
    tpu.vector_store %arg6[%c0_10, %c0_11], %13 {strides = array<i32>} : memref<8x128xf32, #tpu.memory_space<vmem>>, vector<8x128xf32>,
    return
  }
  func.func @transform_0(%arg0: i32, %arg1: i32) -> (i32, i32, i32) {
    %c0_i32 = arith.constant 0 : i32
    %c0_i32_0 = arith.constant 0 : i32
    %c0_i32_1 = arith.constant 0 : i32
    return %c0_i32, %c0_i32_0, %arg0 : i32, i32, i32
  }
  func.func @transform_1(%arg0: i32, %arg1: i32) -> (i32, i32) {
    %c0_i32 = arith.constant 0 : i32
    %c0_i32_0 = arith.constant 0 : i32
    return %arg1, %c0_i32 : i32, i32
  }
  func.func @transform_2(%arg0: i32, %arg1: i32) -> (i32, i32) {
    %c0_i32 = arith.constant 0 : i32
    %c0_i32_0 = arith.constant 0 : i32
    return %arg1, %c0_i32 : i32, i32
  }
  func.func @transform_3(%arg0: i32, %arg1: i32) -> (i32, i32) {
    %c0_i32 = arith.constant 0 : i32
    %c0_i32_0 = arith.constant 0 : i32
    return %arg1, %c0_i32 : i32, i32
  }
  func.func @transform_4(%arg0: i32, %arg1: i32) -> (i32, i32) {
    %c0_i32 = arith.constant 0 : i32
    return %arg1, %arg0 : i32, i32
  }
}

</mosaic_0001>

<bundles_post_ra>
// kernel: tpu_custom_call.1
= control target key start
LH: loop header
LB: loop body
LE: loop exit
PB: predicated region body
PF: predicated region fallthrough
CT: control target
= control target key end

     0   :  { %vm27_vm0 = vcmask 1043456   ;;  %v153_v2 = vmov 0.0   ;;  %vm154_vm1 = vmmov 0   ;;  %v155_v12 = vmov 0   ;;  %s219_s0 = inlined_call_operand.vmem [shape: bf16[4,4,128], index: 0, kind: input, shape index: {}]   ;;  %s220_s1 = inlined_call_operand.vmem [shape: bf16[8,4], index: 1, kind: input, shape index: {}]   ;;  %s221_s2 = inlined_call_operand.vmem [shape: f32[8,1], index: 2, kind: input, shape index: {}]   ;;  %s222_s3 = inlined_call_operand.vmem [shape: f32[8,1], index: 3, kind: input, shape index: {}]   ;;  %s223_s4 = inlined_call_operand.hbm [shape: f32[8,128], index: 4, kind: output, shape index: {}]  }
   0x1   :  { %v19_v0 = vld [vmem:[%s219_s0] sm:$0x3]  ;;  %v20_v1 = vld [vmem:[%s219_s0 + $0x2] sm:$0x3]  ;;  %118 = vmatprep.subr.bf16.mxu0 %v153_v2  ;;  %v21_v3 = vld [vmem:[%s219_s0 + $0x4] sm:$0x3]  ;;  %120 = vmatprep.mubr.msk.bf16.mxu0 %vm154_vm1, %v153_v2 }
   0x2   :  { %v22_v4 = vld [vmem:[%s219_s0 + $0x6] sm:$0x3]  ;;  %v23_v5 = vunpack.c.l.bf16 %v19_v0  ;;  %v24_v6 = vunpack.c.l.bf16 %v20_v1  ;;  %v25_v7 = vunpack.c.l.bf16 %v21_v3  ;;  %128 = vset.pattern.permute.xlu0 %v155_v12 }
   0x3   :  { %v26_v8 = vunpack.c.l.bf16 %v22_v4  ;;  %v86_v9 = vld [vmem:[%s221_s2] sm:$0xff] }
   0x4   :  { %v28_v10 = vsel %vm27_vm0, %v23_v5, 0.0  ;;  %v29_v11 = vsel %vm27_vm0, %v24_v6, 0.0 }
   0x5   :  { %9 = vsyncpa [#allocation3], 0  ;;  %v30_v13 = vadd.f32 %v29_v11, %v28_v10  ;;  %v31_v14 = vsel %vm27_vm0, %v25_v7, 0.0  ;;  %89 = vperm.xlu0 %128, %v86_v9   ;;  %v33_v15 = vsel %vm27_vm0, %v26_v8, 0.0  ;;  %v93_v16 = vld [vmem:[%s222_s3] sm:$0xff]  ;;  %vm42_vm2 = vcmask 1041408  }
   0x6   :  { %v36_v22 = vld [vmem:[%s220_s1] sm:$0xf]  ;;  %vm38_vm3 = vcmask 31744   ;;  %s156_s27 = smov [#allocation2]  }
   0x7   :  { %v32_v17 = vadd.f32 %v31_v14, %v30_v13  ;;  %s107_s28 = sshll.u32 %s156_s27, 4  ;;  %s108_s28 = int_to_ptr.vmem [resolvable:$true] %s107_s28 }
   0x8   :  { %s129_s3 = scalar_lea.vmem %s108_s28, 128  ;;  %p134_p1 = scmp.lt.s32.totalorder %s108_s28, %s108_s28 }
   0x9   :  { %v34_v18 = vadd.f32 %v33_v15, %v32_v17  ;;  %96 = vperm.xlu0 %128, %v93_v16   ;;  %p130_p0 = scmp.ne.s32.totalorder %s108_s28, %s129_s3  ;;  %p135_p2 = scmp.lt.s32.totalorder %s129_s3, %s129_s3 }
   0xb   :  { %v35_v19 = vmul.f32 0.25, %v34_v18  ;;  %p136_p3 = por %p135_p2, %p134_p1 }
   0xd   :  { %v37_v20 = vpack.c.bf16 %v35_v19, %v35_v19  ;;  %p137_p4 = pnand %p136_p3, %p130_p0 }
   0xf   :  { %v44_v21 = vsel %vm42_vm2, %v37_v20, 0 }
  0x10   :  { %119 = vmatpush3.bf16.msra.mxu0 %v44_v21 }
  0x13   :  { %121 = vmatmul.mubr.msk.bf16.vlgmr.msra.gmra.mrb[0].mxu0 %vm38_vm3, %v36_v22 }
  0x84   :  { %v90_v23 = vpop.permute.xlu0 %89 }
  0x88   :  { %v97_v27 = vpop.permute.xlu0 %96 }
  0xe6   :  { %v80_v24 = vpop.f32.mrb[0].mxu0 }
  0xe7   :  { %v92_v25 = vmul.f32 %v90_v23, %v80_v24  ;;  %v122_v26 = vpop.f32.mrb[1].mxu0 }
  0xe8   :  { %v83_v28 = vpop.f32.mrb[2].mxu0 }
  0xe9   :  { %v123_v29 = vpop.f32.mrb[3].mxu0  ;;  %v99_v30 = vadd.f32 %v97_v27, %v92_v25 }
  0xeb   :  { %100 = vst [vmem:[#allocation2] sm:$0xff] %v99_v30 }
  0xec   :  { %140 = shalt.err (!%p137_p4)
}
  0xed   :  { %s141_s30 = scalar_lea.hbm %s223_s4, 128 }
  0xee   :  { %p142_p5 = scmp.ne.s32.totalorder %s223_s4, %s141_s30  ;;  %p145_p6 = scmp.lt.u32.totalorder %s141_s30, %s223_s4 }
  0xf0   :  { %p147_p7 = pnand %p145_p6, %p142_p5 }
  0xf2   :  { %150 = shalt.err (!%p147_p7)
}
  0xf3   :  { %110 = dma.vmem_to_hbm [thread:$0]  %s108_s28, 128, %s223_s4, [#allocation3]  }
  0xf4   :  { %151 = dma.done.wait [#allocation3], 128  }
  0xf5   :  { %152 = vsyncadd [#allocation3], 4294967168 }
  0xf6   :  { %114 = vsyncpa [#allocation3], 1 }

</bundles_post_ra>
